<compile_context>
chip_gen: v6e
topology: v6e:2x2x1
jax: 0.10.0
libtpu: 0.0.40
codegen_flags: <defaults>
</compile_context>

<pallas_src>
import functools

import jax
import jax.numpy as jnp
from jax.experimental import pallas as pl
from jax.experimental.pallas import tpu as pltpu


def _round_up(x, m):
    return (x + m - 1) // m * m


def _mlp_kernel(x_ref, c_ref, w_in_ref, w_h_ref, b_h_ref, w_ot_ref, b_ot_ref,
                o_ref):
    # x_ref:  (tm, frame_size) bf16   unfolded prev_samples frames
    # c_ref:  (tm, dim)        bf16   upper tier conditioning
    # w_in:   (frame_size, dim) f32   input conv weight, transposed
    # w_h:    (dim, dim)        f32   hidden 1x1 conv weight, transposed
    # b_h:    (1, dim)          f32
    # w_ot:   (2, dim)          f32   output 1x1 conv weight (out_ch, dim)
    # b_ot:   (2, 1)            f32
    # o_ref:  (2, tm)           f32   transposed, lane-dense output block
    x = x_ref[...].astype(jnp.float32)
    c = c_ref[...].astype(jnp.float32)
    h = jnp.dot(x, w_in_ref[...], preferred_element_type=jnp.float32) + c
    h = jnp.maximum(h, 0.0)                               # relu(input(x) + cond)
    h = jnp.dot(h, w_h_ref[...],
                preferred_element_type=jnp.float32) + b_h_ref[...]
    h = jnp.maximum(h, 0.0)                               # relu(hidden(x))
    # (2, dim) x (tm, dim), contracting dim on both -> (2, tm).  The result is
    # already transposed, so the store below is lane-dense along tm.
    yt = jax.lax.dot_general(w_ot_ref[...], h, (((1,), (1,)), ((), ())),
                             preferred_element_type=jnp.float32)
    yt = yt + b_ot_ref[...]
    # channel 0 untouched, channel 1 clamped to min=-8
    row = jax.lax.broadcasted_iota(jnp.int32, yt.shape, 0)
    yt = jnp.where(row == 1, jnp.maximum(yt, -8.0), yt)
    o_ref[...] = yt.astype(o_ref.dtype)


def sample_level_mlp(prev_samples, upper_tier_conditioning,
                     w_in, w_h, b_h, w_o, b_o, *, frame_size, tm=2048):
    """prev_samples: (B, L) float32; upper_tier_conditioning: (B, T, dim) with
    T = L - frame_size + 1.  Returns (B, T, 2) float32.

    tm is the row-tile tuning knob (rows = flattened (batch, time) positions
    per grid step); it is rounded up to a multiple of 128 (lane-dense output
    blocks) and capped for small problems so tiny inputs are not over-padded.
    """
    B, L = prev_samples.shape
    T = L - frame_size + 1
    dim = w_in.shape[1]
    assert upper_tier_conditioning.shape == (B, T, dim)

    M = B * T
    tm = max(128, _round_up(int(tm), 128))   # multiple of 128 for lane-dense out
    tm = min(tm, _round_up(M, 128))          # don't over-pad small problems
    M_pad = _round_up(M, tm)

    # Glue: unfold the 1-channel signal into sliding frames (the conv's
    # im2col), already in bf16 so the materialized slab and the kernel's
    # streaming HBM traffic stay small.
    # TODO(synk): build the frames inside the kernel from a pl.ANY window of
    # prev_samples to avoid materializing X in HBM at all (~10-20% traffic).
    idx = jnp.arange(T)[:, None] + jnp.arange(frame_size)[None, :]   # (T, fs)
    X = prev_samples.astype(jnp.bfloat16)[:, idx].reshape(M, frame_size)
    C = upper_tier_conditioning.astype(jnp.bfloat16).reshape(M, dim)
    if M_pad != M:
        X = jnp.pad(X, ((0, M_pad - M), (0, 0)))
        C = jnp.pad(C, ((0, M_pad - M), (0, 0)))

    w_in_f = w_in.astype(jnp.float32)                    # (fs, dim)
    w_h_f = w_h.astype(jnp.float32)                      # (dim, dim)
    b_h_f = b_h.reshape(1, dim).astype(jnp.float32)      # (1, dim)
    w_ot = w_o.astype(jnp.float32).T                     # (2, dim)
    b_ot = b_o.reshape(2, 1).astype(jnp.float32)         # (2, 1)

    out_t = pl.pallas_call(
        _mlp_kernel,
        out_shape=jax.ShapeDtypeStruct((2, M_pad), jnp.float32),
        grid_spec=pltpu.PrefetchScalarGridSpec(
            num_scalar_prefetch=0,
            grid=(M_pad // tm,),
            in_specs=[
                pl.BlockSpec((tm, frame_size), lambda i: (i, 0)),
                pl.BlockSpec((tm, dim), lambda i: (i, 0)),
                pl.BlockSpec((frame_size, dim), lambda i: (0, 0)),
                pl.BlockSpec((dim, dim), lambda i: (0, 0)),
                pl.BlockSpec((1, dim), lambda i: (0, 0)),
                pl.BlockSpec((2, dim), lambda i: (0, 0)),
                pl.BlockSpec((2, 1), lambda i: (0, 0)),
            ],
            out_specs=pl.BlockSpec((2, tm), lambda i: (0, i)),
        ),
        compiler_params=pltpu.CompilerParams(
            dimension_semantics=("parallel",)),
    )(X, C, w_in_f, w_h_f, b_h_f, w_ot, b_ot)

    # (2, M_pad) -> (B, T, 2): drop the padding and undo the transpose.
    return out_t[:, :M].T.reshape(B, T, 2)


def _reference(prev_samples, cond, w_in, w_h, b_h, w_o, b_o, *, frame_size):
    """Pure-JAX reference mirroring the PyTorch forward (f32, high precision)."""
    B, L = prev_samples.shape
    T = L - frame_size + 1
    hi = jax.lax.Precision.HIGHEST
    idx = jnp.arange(T)[:, None] + jnp.arange(frame_size)[None, :]
    X = prev_samples[:, idx]                                      # (B, T, fs)
    h = jnp.einsum("btf,fd->btd", X, w_in, precision=hi) + cond   # input + cond
    h = jax.nn.relu(h)
    h = jax.nn.relu(jnp.einsum("btd,de->bte", h, w_h, precision=hi) + b_h)
    y = jnp.einsum("btd,de->bte", h, w_o, precision=hi) + b_o     # (B, T, 2)
    return jnp.concatenate(
        [y[..., 0:1], jnp.maximum(y[..., 1:2], -8.0)], axis=-1)


if __name__ == "__main__":
    # Small shapes consistent with the module.
    frame_size = 4
    dim = 32
    q_levels = 256          # unused in forward, kept for fidelity
    B = 2
    T = 8
    L = T + frame_size - 1  # 11

    key = jax.random.PRNGKey(0)
    k1, k2, k3, k4, k5 = jax.random.split(key, 5)

    # Deterministic parameter init (matching the __init__ shapes / schemes):
    # input:  Conv1d(1, dim, frame_size, bias=False), xavier_uniform gain=0.01
    fan_in_in, fan_out_in = 1 * frame_size, dim * frame_size
    bnd_in = 0.01 * (6.0 / (fan_in_in + fan_out_in)) ** 0.5
    w_in = jax.random.uniform(k1, (frame_size, dim), jnp.float32,
                              -bnd_in, bnd_in)            # transposed layout
    # hidden: Conv1d(dim, dim, 1), xavier_uniform gain=0.01, bias=0
    bnd_h = 0.01 * (6.0 / (dim + dim)) ** 0.5
    w_h = jax.random.uniform(k2, (dim, dim), jnp.float32, -bnd_h, bnd_h)
    b_h = jnp.zeros((1, dim), jnp.float32)
    # output: Conv1d(dim, 2, 1), lecun_uniform (bound = sqrt(3/fan_in)), bias=0
    bnd_o = (3.0 / dim) ** 0.5
    w_o = jax.random.uniform(k3, (dim, 2), jnp.float32, -bnd_o, bnd_o)
    b_o = jnp.zeros((1, 2), jnp.float32)

    prev_samples = jax.random.normal(k4, (B, L), jnp.float32)
    upper_cond = 8.0 * jax.random.normal(k5, (B, T, dim), jnp.float32)

    fwd = jax.jit(functools.partial(sample_level_mlp, frame_size=frame_size))
    out = jax.block_until_ready(
        fwd(prev_samples, upper_cond, w_in, w_h, b_h, w_o, b_o))
    assert out.shape == (B, T, 2), out.shape

    # Tight check: reference evaluated on the same bf16-rounded inputs the
    # kernel streams (isolates the kernel math from the bf16 storage format).
    ps_b = prev_samples.astype(jnp.bfloat16).astype(jnp.float32)
    uc_b = upper_cond.astype(jnp.bfloat16).astype(jnp.float32)
    ref_b = _reference(ps_b, uc_b, w_in, w_h, b_h, w_o, b_o,
                       frame_size=frame_size)
    err_b = float(jnp.max(jnp.abs(out - ref_b)))
    assert jnp.allclose(out, ref_b, rtol=2e-2, atol=2e-2), err_b

    # Loose end-to-end check against the pure-f32 reference (bf16 input
    # streaming is an intentional, bandwidth-motivated approximation).
    ref = _reference(prev_samples, upper_cond, w_in, w_h, b_h, w_o, b_o,
                     frame_size=frame_size)
    err = float(jnp.max(jnp.abs(out - ref)))
    assert jnp.allclose(out, ref, rtol=1e-1, atol=2e-1), err

    print("KERNEL_OK")
</pallas_src>

<mosaic_0001>
module attributes {stable_mosaic.version = 11 : i64} {
  func.func @_mlp_kernel(%arg0: i32, %arg1: memref<128x4xbf16, #tpu.memory_space<vmem>>, %arg2: memref<128x32xbf16, #tpu.memory_space<vmem>>, %arg3: memref<4x32xf32, #tpu.memory_space<vmem>>, %arg4: memref<32x32xf32, #tpu.memory_space<vmem>>, %arg5: memref<1x32xf32, #tpu.memory_space<vmem>>, %arg6: memref<2x32xf32, #tpu.memory_space<vmem>>, %arg7: memref<2x1xf32, #tpu.memory_space<vmem>>, %arg8: memref<2x128xf32, #tpu.memory_space<vmem>>) attributes {dimension_semantics = [#tpu.dimension_semantics<parallel>], iteration_bounds = array<i64: 1>, scalar_prefetch = 0 : i64, scratch_operands = 0 : i64, tpu.core_type = #tpu.core_type<tc>, window_params = [{transform_indices = @transform_0, window_bounds = array<i64: 128, 4>}, {transform_indices = @transform_1, window_bounds = array<i64: 128, 32>}, {pipeline_mode = #tpu.pipeline_mode<synchronous>, transform_indices = @transform_2, window_bounds = array<i64: 4, 32>}, {pipeline_mode = #tpu.pipeline_mode<synchronous>, transform_indices = @transform_3, window_bounds = array<i64: 32, 32>}, {pipeline_mode = #tpu.pipeline_mode<synchronous>, transform_indices = @transform_4, window_bounds = array<i64: 1, 32>}, {pipeline_mode = #tpu.pipeline_mode<synchronous>, transform_indices = @transform_5, window_bounds = array<i64: 2, 32>}, {pipeline_mode = #tpu.pipeline_mode<synchronous>, transform_indices = @transform_6, window_bounds = array<i64: 2, 1>}, {transform_indices = @transform_7, window_bounds = array<i64: 2, 128>}]} {
    %c0 = arith.constant 0 : index
    %c0_0 = arith.constant 0 : index
    %0 = vector.load %arg1[%c0, %c0_0] : memref<128x4xbf16, #tpu.memory_space<vmem>>, vector<128x4xbf16>
    %1 = arith.extf %0 : vector<128x4xbf16> to vector<128x4xf32>
    %c0_1 = arith.constant 0 : index
    %c0_2 = arith.constant 0 : index
    %2 = vector.load %arg2[%c0_1, %c0_2] : memref<128x32xbf16, #tpu.memory_space<vmem>>, vector<128x32xbf16>
    %3 = arith.extf %2 : vector<128x32xbf16> to vector<128x32xf32>
    %c0_3 = arith.constant 0 : index
    %c0_4 = arith.constant 0 : index
    %4 = vector.load %arg3[%c0_3, %c0_4] : memref<4x32xf32, #tpu.memory_space<vmem>>, vector<4x32xf32>
    %cst = arith.constant dense<0.000000e+00> : vector<128x32xf32>
    %5 = tpu.matmul %1, %4, %cst {dimension_numbers = #tpu.dot_dimension_numbers<[1], [0], [0], [1], [0, 0, 1, 1], [], []>} : vector<128x4xf32>, vector<4x32xf32>, vector<128x32xf32> -> vector<128x32xf32>
    %6 = arith.addf %5, %3 : vector<128x32xf32>
    %cst_5 = arith.constant 0.000000e+00 : f32
    %7 = vector.broadcast %cst_5 : f32 to vector<128x32xf32>
    %8 = arith.maximumf %6, %7 : vector<128x32xf32>
    %c0_6 = arith.constant 0 : index
    %c0_7 = arith.constant 0 : index
    %9 = vector.load %arg4[%c0_6, %c0_7] : memref<32x32xf32, #tpu.memory_space<vmem>>, vector<32x32xf32>
    %cst_8 = arith.constant dense<0.000000e+00> : vector<128x32xf32>
    %10 = tpu.matmul %8, %9, %cst_8 {dimension_numbers = #tpu.dot_dimension_numbers<[1], [0], [0], [1], [0, 0, 1, 1], [], []>} : vector<128x32xf32>, vector<32x32xf32>, vector<128x32xf32> -> vector<128x32xf32>
    %c0_9 = arith.constant 0 : index
    %c0_10 = arith.constant 0 : index
    %11 = vector.load %arg5[%c0_9, %c0_10] : memref<1x32xf32, #tpu.memory_space<vmem>>, vector<1x32xf32>
    %12 = vector.broadcast %11 : vector<1x32xf32> to vector<128x32xf32>
    %13 = arith.addf %10, %12 : vector<128x32xf32>
    %cst_11 = arith.constant 0.000000e+00 : f32
    %14 = vector.broadcast %cst_11 : f32 to vector<128x32xf32>
    %15 = arith.maximumf %13, %14 : vector<128x32xf32>
    %c0_12 = arith.constant 0 : index
    %c0_13 = arith.constant 0 : index
    %16 = vector.load %arg6[%c0_12, %c0_13] : memref<2x32xf32, #tpu.memory_space<vmem>>, vector<2x32xf32>
    %cst_14 = arith.constant dense<0.000000e+00> : vector<2x128xf32>
    %17 = tpu.matmul %16, %15, %cst_14 {dimension_numbers = #tpu.dot_dimension_numbers<[1], [1], [0], [0], [0, 0, 1, 0], [], []>} : vector<2x32xf32>, vector<128x32xf32>, vector<2x128xf32> -> vector<2x128xf32>
    %c0_15 = arith.constant 0 : index
    %c0_16 = arith.constant 0 : index
    %18 = vector.load %arg7[%c0_15, %c0_16] : memref<2x1xf32, #tpu.memory_space<vmem>>, vector<2x1xf32>
    %19 = vector.broadcast %18 : vector<2x1xf32> to vector<2x128xf32>
    %20 = arith.addf %17, %19 : vector<2x128xf32>
    %21 = tpu.iota {dimensions = array<i32: 0>} : vector<2x128xi32>
    %c1_i32 = arith.constant 1 : i32
    %22 = vector.broadcast %c1_i32 : i32 to vector<2x128xi32>
    %23 = arith.cmpi eq, %21, %22 : vector<2x128xi32>
    %cst_17 = arith.constant -8.000000e+00 : f32
    %24 = vector.broadcast %cst_17 : f32 to vector<2x128xf32>
    %25 = arith.maximumf %20, %24 : vector<2x128xf32>
    %26 = arith.select %23, %25, %20 : vector<2x128xi1>, vector<2x128xf32>
    %c0_18 = arith.constant 0 : index
    %c0_19 = arith.constant 0 : index
    %27 = vector.load %arg8[%c0_18, %c0_19] : memref<2x128xf32, #tpu.memory_space<vmem>>, vector<2x128xf32>
    tpu.vector_store %arg8[%c0_18, %c0_19], %26 {strides = array<i32>} : memref<2x128xf32, #tpu.memory_space<vmem>>, vector<2x128xf32>,
    return
  }
  func.func @transform_0(%arg0: i32) -> (i32, i32) {
    %c0_i32 = arith.constant 0 : i32
    %c0_i32_0 = arith.constant 0 : i32
    return %arg0, %c0_i32 : i32, i32
  }
  func.func @transform_1(%arg0: i32) -> (i32, i32) {
    %c0_i32 = arith.constant 0 : i32
    %c0_i32_0 = arith.constant 0 : i32
    return %arg0, %c0_i32 : i32, i32
  }
  func.func @transform_2(%arg0: i32) -> (i32, i32) {
    %c0_i32 = arith.constant 0 : i32
    %c0_i32_0 = arith.constant 0 : i32
    %c0_i32_1 = arith.constant 0 : i32
    return %c0_i32, %c0_i32_0 : i32, i32
  }
  func.func @transform_3(%arg0: i32) -> (i32, i32) {
    %c0_i32 = arith.constant 0 : i32
    %c0_i32_0 = arith.constant 0 : i32
    %c0_i32_1 = arith.constant 0 : i32
    return %c0_i32, %c0_i32_0 : i32, i32
  }
  func.func @transform_4(%arg0: i32) -> (i32, i32) {
    %c0_i32 = arith.constant 0 : i32
    %c0_i32_0 = arith.constant 0 : i32
    %c0_i32_1 = arith.constant 0 : i32
    return %c0_i32, %c0_i32_0 : i32, i32
  }
  func.func @transform_5(%arg0: i32) -> (i32, i32) {
    %c0_i32 = arith.constant 0 : i32
    %c0_i32_0 = arith.constant 0 : i32
    %c0_i32_1 = arith.constant 0 : i32
    return %c0_i32, %c0_i32_0 : i32, i32
  }
  func.func @transform_6(%arg0: i32) -> (i32, i32) {
    %c0_i32 = arith.constant 0 : i32
    %c0_i32_0 = arith.constant 0 : i32
    %c0_i32_1 = arith.constant 0 : i32
    return %c0_i32, %c0_i32_0 : i32, i32
  }
  func.func @transform_7(%arg0: i32) -> (i32, i32) {
    %c0_i32 = arith.constant 0 : i32
    %c0_i32_0 = arith.constant 0 : i32
    return %c0_i32, %arg0 : i32, i32
  }
}

</mosaic_0001>

<bundles_post_ra>
// kernel: sample_level_mlp.1
= control target key start
LH: loop header
LB: loop body
LE: loop exit
PB: predicated region body
PF: predicated region fallthrough
CT: control target
= control target key end

     0   :  { %vm140_vm0 = vcmask 1043456   ;;  %vm91_vm1 = vcmask 31744   ;;  %vm316_vm2 = vcmask 261120   ;;  %vm945_vm3 = vmmov 0   ;;  %s1137_s2 = inlined_call_operand.vmem [shape: f32[4,32], index: 2, kind: input, shape index: {}]   ;;  %s1138_s0 = inlined_call_operand.vmem [shape: bf16[128,4], index: 0, kind: input, shape index: {}]   ;;  %s1139_s3 = inlined_call_operand.vmem [shape: f32[32,32], index: 3, kind: input, shape index: {}]   ;;  %s1140_s1 = inlined_call_operand.vmem [shape: bf16[128,32], index: 1, kind: input, shape index: {}]   ;;  %s1141_s6 = inlined_call_operand.vmem [shape: f32[2,1], index: 6, kind: input, shape index: {}]   ;;  %s1142_s4 = inlined_call_operand.vmem [shape: f32[1,32], index: 4, kind: input, shape index: {}]   ;;  %s1143_s5 = inlined_call_operand.vmem [shape: f32[2,32], index: 5, kind: input, shape index: {}]   ;;  %s1144_s7 = inlined_call_operand.vmem [shape: f32[2,128], index: 7, kind: output, shape index: {}]  }
   0x1   :  { %v90_v0 = vld [vmem:[%s1137_s2] sm:$0xf]  ;;  %v779_v2 = vld [vmem:[%s1138_s0 + $0x8] sm:$0xff]   ;;  %v780_v6 = vld [vmem:[%s1138_s0 + $0x10] sm:$0xff]  }
   0x2   :  { %v716_v1 = vld [vmem:[%s1138_s0] sm:$0xff]   ;;  %847 = vmatprep.subr.msk.mxu1 %vm140_vm0, %v90_v0  ;;  %v721_v5 = vunpack.c.l.bf16 %v779_v2  ;;  %v308_v7 = vld [vmem:[%s1139_s3 + $0x18] sm:$0xff]  ;;  %v307_v8 = vld [vmem:[%s1139_s3 + $0x10] sm:$0xff]  ;;  %v722_v9 = vunpack.c.h.bf16 %v779_v2  ;;  %v725_v10 = vunpack.c.l.bf16 %v780_v6  ;;  %v726_v14 = vunpack.c.h.bf16 %v780_v6 }
   0x3   :  { %v717_v3 = vunpack.c.l.bf16 %v716_v1  ;;  %v718_v4 = vunpack.c.h.bf16 %v716_v1  ;;  %848 = vmatpush3.msk.msra.mxu1 %vm140_vm0, %v90_v0  ;;  %v306_v11 = vld [vmem:[%s1139_s3 + $0x8] sm:$0xff]  ;;  %v781_v12 = vld [vmem:[%s1138_s0 + $0x18] sm:$0xff]   ;;  %v305_v13 = vld [vmem:[%s1139_s3] sm:$0xff] }
   0x4   :  { %873 = vmatprep.subr.mxu1 %v308_v7  ;;  %v729_v15 = vunpack.c.l.bf16 %v781_v12  ;;  %v782_v16 = vld [vmem:[%s1138_s0 + $0x20] sm:$0xff]   ;;  %v730_v17 = vunpack.c.h.bf16 %v781_v12  ;;  %v783_v19 = vld [vmem:[%s1138_s0 + $0x28] sm:$0xff]   ;;  %v784_v22 = vld [vmem:[%s1138_s0 + $0x30] sm:$0xff]  }
   0x5   :  { %849 = vmatprep.mubr.msk.f32.mxu1 %vm91_vm1, %v717_v3  ;;  %v733_v18 = vunpack.c.l.bf16 %v782_v16  ;;  %v734_v20 = vunpack.c.h.bf16 %v782_v16  ;;  %v737_v21 = vunpack.c.l.bf16 %v783_v19  ;;  %v738_v23 = vunpack.c.h.bf16 %v783_v19  ;;  %v785_v25 = vld [vmem:[%s1138_s0 + $0x38] sm:$0xff]   ;;  %v748_v29 = vld [vmem:[%s1140_s1] sm:$0xff]   ;;  %v786_v32 = vld [vmem:[%s1140_s1 + $0x8] sm:$0xff]  }
   0x6   :  { %850 = vmatmul.mubr.msk.f32.vlgmr.msra.gmra.mxu1 %vm91_vm1, %v718_v4  ;;  %v741_v24 = vunpack.c.l.bf16 %v784_v22  ;;  %v742_v26 = vunpack.c.h.bf16 %v784_v22  ;;  %v745_v27 = vunpack.c.l.bf16 %v785_v25  ;;  %v746_v28 = vunpack.c.h.bf16 %v785_v25  ;;  %v787_v39 = vld [vmem:[%s1140_s1 + $0x10] sm:$0xff]   ;;  %v788_v48 = vld [vmem:[%s1140_s1 + $0x18] sm:$0xff]   ;;  %v789_v57 = vld [vmem:[%s1140_s1 + $0x20] sm:$0xff]  }
   0x7   :  { %852 = vmatprep.mubr.msk.f32.mxu1 %vm91_vm1, %v721_v5  ;;  %874 = vmatpush3.msra.mxu1 %v308_v7  ;;  %v750_v30 = vunpack.c.h.bf16 %v748_v29  ;;  %v749_v31 = vunpack.c.l.bf16 %v748_v29  ;;  %v754_v36 = vunpack.c.h.bf16 %v786_v32  ;;  %v753_v38 = vunpack.c.l.bf16 %v786_v32  ;;  %v790_v2 = vld [vmem:[%s1140_s1 + $0x28] sm:$0xff]  }
   0x8   :  { %875 = vmatprep.subr.mxu1 %v307_v8  ;;  %v758_v45 = vunpack.c.h.bf16 %v787_v39  ;;  %v757_v47 = vunpack.c.l.bf16 %v787_v39  ;;  %v762_v54 = vunpack.c.h.bf16 %v788_v48  ;;  %v761_v56 = vunpack.c.l.bf16 %v788_v48  ;;  %v527_v39 = vld [vmem:[%s1141_s6] sm:$0x3] }
   0x9   :  { %876 = vmatpush3.msra.mxu1 %v307_v8  ;;  %v766_v63 = vunpack.c.h.bf16 %v789_v57  ;;  %v765_v1 = vunpack.c.l.bf16 %v789_v57  ;;  %v770_v8 = vunpack.c.h.bf16 %v790_v2 }
   0xa   :  { %853 = vmatmul.mubr.msk.f32.gmra.mxu1 %vm91_vm1, %v722_v9  ;;  %877 = vmatprep.subr.mxu1 %v306_v11 }
   0xb   :  { %855 = vmatprep.mubr.msk.f32.mxu1 %vm91_vm1, %v725_v10  ;;  %878 = vmatpush3.msra.mxu1 %v306_v11  ;;  %v769_v10 = vunpack.c.l.bf16 %v790_v2  ;;  %v791_v11 = vld [vmem:[%s1140_s1 + $0x30] sm:$0xff]  }
   0xc   :  { %879 = vmatprep.subr.mxu1 %v305_v13  ;;  %v773_v19 = vunpack.c.l.bf16 %v791_v11 }
   0xd   :  { %880 = vmatpush3.msra.mxu1 %v305_v13 }
   0xe   :  { %856 = vmatmul.mubr.msk.f32.gmra.mxu1 %vm91_vm1, %v726_v14 }
   0xf   :  { %858 = vmatprep.mubr.msk.f32.mxu1 %vm91_vm1, %v729_v15 }
  0x12   :  { %859 = vmatmul.mubr.msk.f32.gmra.mxu1 %vm91_vm1, %v730_v17  ;;  %v774_v17 = vunpack.c.h.bf16 %v791_v11 }
  0x13   :  { %861 = vmatprep.mubr.msk.f32.mxu1 %vm91_vm1, %v733_v18 }
  0x16   :  { %862 = vmatmul.mubr.msk.f32.gmra.mxu1 %vm91_vm1, %v734_v20  ;;  %v792_v20 = vld [vmem:[%s1140_s1 + $0x38] sm:$0xff]  }
  0x17   :  { %864 = vmatprep.mubr.msk.f32.mxu1 %vm91_vm1, %v737_v21 }
  0x1a   :  { %865 = vmatmul.mubr.msk.f32.gmra.mxu1 %vm91_vm1, %v738_v23 }
  0x1b   :  { %867 = vmatprep.mubr.msk.f32.mxu1 %vm91_vm1, %v741_v24 }
  0x1e   :  { %868 = vmatmul.mubr.msk.f32.gmra.mxu1 %vm91_vm1, %v742_v26  ;;  %v778_v26 = vunpack.c.h.bf16 %v792_v20 }
  0x1f   :  { %870 = vmatprep.mubr.msk.f32.mxu1 %vm91_vm1, %v745_v27 }
  0x22   :  { %871 = vmatmul.mubr.msk.f32.gmra.mxu1 %vm91_vm1, %v746_v28  ;;  %v777_v28 = vunpack.c.l.bf16 %v792_v20 }
  0xc6   :  { %v851_v33 = vpop.f32.mrf.mxu1 }
  0xc7   :  { %v216_v34 = vadd.f32 %v851_v33, %v750_v30 }
  0xc8   :  { %v210_v35 = vpop.f32.mrf.mxu1 }
  0xc9   :  { %v211_v37 = vadd.f32 %v749_v31, %v210_v35  ;;  %v290_v42 = vmax.f32 %v216_v34, 0.0 }
  0xca   :  { %v854_v40 = vpop.f32.mrf.mxu1 }
  0xcb   :  { %v289_v41 = vmax.f32 %v211_v37, 0.0  ;;  %v226_v43 = vadd.f32 %v854_v40, %v754_v36  ;;  %v944_v37 = vmov 0.0  }
  0xcc   :  { %v220_v44 = vpop.f32.mrf.mxu1  ;;  %905 = vmatprep.subr.mxu0 %v944_v37  ;;  %937 = vmatprep.mubr.msk.f32.mxu0 %vm945_vm3, %v944_v37 }
  0xcd   :  { %v221_v46 = vadd.f32 %v753_v38, %v220_v44  ;;  %881 = vmatprep.mubr.msk.f32.mxu1 %vm316_vm2, %v289_v41  ;;  %v292_v51 = vmax.f32 %v226_v43, 0.0  ;;  %v946_v38 = vmov 0  }
  0xce   :  { %v857_v49 = vpop.f32.mrf.mxu1  ;;  %882 = vmatmul.mubr.msk.f32.vlgmr.msra.gmra.mxu1 %vm316_vm2, %v290_v42  ;;  %943 = vset.pattern.permute.xlu0 %v946_v38 }
  0xcf   :  { %v291_v50 = vmax.f32 %v221_v46, 0.0  ;;  %v236_v52 = vadd.f32 %v857_v49, %v758_v45  ;;  %530 = vperm.xlu0 %943, %v527_v39  }
  0xd0   :  { %v230_v53 = vpop.f32.mrf.mxu1 }
  0xd1   :  { %v231_v55 = vadd.f32 %v757_v47, %v230_v53  ;;  %884 = vmatprep.mubr.msk.f32.mxu1 %vm316_vm2, %v291_v50  ;;  %v294_v60 = vmax.f32 %v236_v52, 0.0 }
  0xd2   :  { %v860_v58 = vpop.f32.mrf.mxu1  ;;  %885 = vmatmul.mubr.msk.f32.gmra.mxu1 %vm316_vm2, %v292_v51 }
  0xd3   :  { %v293_v59 = vmax.f32 %v231_v55, 0.0  ;;  %v246_v61 = vadd.f32 %v860_v58, %v762_v54  ;;  %v681_v54 = vld [vmem:[%s1142_s4] ss:$0 sm:$0xff] }
  0xd4   :  { %v240_v62 = vpop.f32.mrf.mxu1 }
  0xd5   :  { %v241_v0 = vadd.f32 %v761_v56, %v240_v62  ;;  %887 = vmatprep.mubr.msk.f32.mxu1 %vm316_vm2, %v293_v59  ;;  %v296_v5 = vmax.f32 %v246_v61, 0.0 }
  0xd6   :  { %v863_v3 = vpop.f32.mrf.mxu1  ;;  %888 = vmatmul.mubr.msk.f32.gmra.mxu1 %vm316_vm2, %v294_v60 }
  0xd7   :  { %v295_v4 = vmax.f32 %v241_v0, 0.0  ;;  %v256_v6 = vadd.f32 %v863_v3, %v766_v63 }
  0xd8   :  { %v250_v7 = vpop.f32.mrf.mxu1 }
  0xd9   :  { %v251_v9 = vadd.f32 %v765_v1, %v250_v7  ;;  %890 = vmatprep.mubr.msk.f32.mxu1 %vm316_vm2, %v295_v4  ;;  %v298_v14 = vmax.f32 %v256_v6, 0.0 }
  0xda   :  { %v866_v12 = vpop.f32.mrf.mxu1  ;;  %891 = vmatmul.mubr.msk.f32.gmra.mxu1 %vm316_vm2, %v296_v5 }
  0xdb   :  { %v297_v13 = vmax.f32 %v251_v9, 0.0  ;;  %v266_v15 = vadd.f32 %v866_v12, %v770_v8 }
  0xdc   :  { %v260_v16 = vpop.f32.mrf.mxu1 }
  0xdd   :  { %v261_v18 = vadd.f32 %v769_v10, %v260_v16  ;;  %893 = vmatprep.mubr.msk.f32.mxu1 %vm316_vm2, %v297_v13  ;;  %v300_v23 = vmax.f32 %v266_v15, 0.0 }
  0xde   :  { %v869_v21 = vpop.f32.mrf.mxu1  ;;  %894 = vmatmul.mubr.msk.f32.gmra.mxu1 %vm316_vm2, %v298_v14 }
  0xdf   :  { %v299_v22 = vmax.f32 %v261_v18, 0.0  ;;  %v276_v24 = vadd.f32 %v869_v21, %v774_v17 }
  0xe0   :  { %v270_v25 = vpop.f32.mrf.mxu1 }
  0xe1   :  { %v271_v27 = vadd.f32 %v773_v19, %v270_v25  ;;  %896 = vmatprep.mubr.msk.f32.mxu1 %vm316_vm2, %v299_v22  ;;  %v302_v31 = vmax.f32 %v276_v24, 0.0  ;;  %v526_v25 = vld [vmem:[%s1143_s5] sm:$0x3] }
  0xe2   :  { %v872_v29 = vpop.f32.mrf.mxu1  ;;  %897 = vmatmul.mubr.msk.f32.gmra.mxu1 %vm316_vm2, %v300_v23 }
  0xe3   :  { %v301_v30 = vmax.f32 %v271_v27, 0.0  ;;  %v286_v32 = vadd.f32 %v872_v29, %v778_v26  ;;  %v654_v26 = vlaneseq }
  0xe4   :  { %v280_v33 = vpop.f32.mrf.mxu1 }
  0xe5   :  { %v281_v34 = vadd.f32 %v777_v28, %v280_v33  ;;  %899 = vmatprep.mubr.msk.f32.mxu1 %vm316_vm2, %v301_v30  ;;  %v304_v36 = vmax.f32 %v286_v32, 0.0  ;;  %v655_v28 = vshrl.u32 %v654_v26, 7 }
  0xe6   :  { %900 = vmatmul.mubr.msk.f32.gmra.mxu1 %vm316_vm2, %v302_v31 }
  0xe7   :  { %v303_v35 = vmax.f32 %v281_v34, 0.0  ;;  %vm656_vm4 = vcmp.eq.s32.totalorder %v655_v28, 1 }
  0xe9   :  { %902 = vmatprep.mubr.msk.f32.mxu1 %vm316_vm2, %v303_v35 }
  0xea   :  { %903 = vmatmul.mubr.msk.f32.gmra.mxu1 %vm316_vm2, %v304_v36 }
 0x14a   :  { %v531_v27 = vpop.permute.xlu0 %530 }
 0x18e   :  { %v1087_v40 = vpop.f32.mrf.mxu1 }
 0x18f   :  { %v437_v20 = vadd.f32 %v1087_v40, %v681_v54 }
 0x190   :  { %v1089_v41 = vpop.f32.mrf.mxu1 }
 0x191   :  { %v511_v22 = vmax.f32 %v437_v20, 0.0  ;;  %v432_v23 = vadd.f32 %v681_v54, %v1089_v41 }
 0x192   :  { %v886_v42 = vpop.f32.mrf.mxu1 }
 0x193   :  { %v447_v16 = vadd.f32 %v886_v42, %v681_v54  ;;  %v510_v24 = vmax.f32 %v432_v23, 0.0 }
 0x194   :  { %v1091_v43 = vpop.f32.mrf.mxu1 }
 0x195   :  { %v513_v18 = vmax.f32 %v447_v16, 0.0  ;;  %v442_v19 = vadd.f32 %v681_v54, %v1091_v43 }
 0x196   :  { %v889_v44 = vpop.f32.mrf.mxu1 }
 0x197   :  { %v457_v12 = vadd.f32 %v889_v44, %v681_v54  ;;  %v512_v21 = vmax.f32 %v442_v19, 0.0 }
 0x198   :  { %v451_v45 = vpop.f32.mrf.mxu1 }
 0x199   :  { %v515_v14 = vmax.f32 %v457_v12, 0.0  ;;  %v452_v15 = vadd.f32 %v681_v54, %v451_v45 }
 0x19a   :  { %v892_v46 = vpop.f32.mrf.mxu1 }
 0x19b   :  { %v467_v8 = vadd.f32 %v892_v46, %v681_v54  ;;  %v514_v17 = vmax.f32 %v452_v15, 0.0 }
 0x19c   :  { %v461_v47 = vpop.f32.mrf.mxu1 }
 0x19d   :  { %v517_v10 = vmax.f32 %v467_v8, 0.0  ;;  %v462_v11 = vadd.f32 %v681_v54, %v461_v47 }
 0x19e   :  { %v895_v48 = vpop.f32.mrf.mxu1 }
 0x19f   :  { %v477_v4 = vadd.f32 %v895_v48, %v681_v54  ;;  %v516_v13 = vmax.f32 %v462_v11, 0.0 }
 0x1a0   :  { %v471_v49 = vpop.f32.mrf.mxu1 }
 0x1a1   :  { %v519_v6 = vmax.f32 %v477_v4, 0.0  ;;  %v472_v7 = vadd.f32 %v681_v54, %v471_v49 }
 0x1a2   :  { %v898_v50 = vpop.f32.mrf.mxu1 }
 0x1a3   :  { %v487_v0 = vadd.f32 %v898_v50, %v681_v54  ;;  %v518_v9 = vmax.f32 %v472_v7, 0.0 }
 0x1a4   :  { %v481_v51 = vpop.f32.mrf.mxu1 }
 0x1a5   :  { %v521_v2 = vmax.f32 %v487_v0, 0.0  ;;  %v482_v3 = vadd.f32 %v681_v54, %v481_v51 }
 0x1a6   :  { %v901_v52 = vpop.f32.mrf.mxu1 }
 0x1a7   :  { %v497_v60 = vadd.f32 %v901_v52, %v681_v54  ;;  %v520_v5 = vmax.f32 %v482_v3, 0.0 }
 0x1a8   :  { %v491_v53 = vpop.f32.mrf.mxu1 }
 0x1a9   :  { %v523_v62 = vmax.f32 %v497_v60, 0.0  ;;  %v492_v63 = vadd.f32 %v681_v54, %v491_v53 }
 0x1aa   :  { %v904_v55 = vpop.f32.mrf.mxu1 }
 0x1ab   :  { %v507_v56 = vadd.f32 %v904_v55, %v681_v54  ;;  %v522_v1 = vmax.f32 %v492_v63, 0.0 }
 0x1ac   :  { %v501_v57 = vpop.f32.mrf.mxu1 }
 0x1ad   :  { %v525_v58 = vmax.f32 %v507_v56, 0.0  ;;  %v502_v59 = vadd.f32 %v681_v54, %v501_v57 }
 0x1af   :  { %906 = vmatpush3.xpose.msk.msra.mxu0 %vm316_vm2, %v525_v58  ;;  %v524_v61 = vmax.f32 %v502_v59, 0.0 }
 0x1b0   :  { %907 = vmatprep.subr.mxu0 %v944_v37 }
 0x1b3   :  { %908 = vmatpush3.xpose.msk.msra.mxu0 %vm316_vm2, %v524_v61 }
 0x1b4   :  { %909 = vmatprep.subr.mxu0 %v944_v37 }
 0x1b7   :  { %910 = vmatpush3.xpose.msk.msra.mxu0 %vm316_vm2, %v523_v62 }
 0x1b8   :  { %911 = vmatprep.subr.mxu0 %v944_v37 }
 0x1bb   :  { %912 = vmatpush3.xpose.msk.msra.mxu0 %vm316_vm2, %v522_v1 }
 0x1bc   :  { %913 = vmatprep.subr.mxu0 %v944_v37 }
 0x1bf   :  { %914 = vmatpush3.xpose.msk.msra.mxu0 %vm316_vm2, %v521_v2 }
 0x1c0   :  { %915 = vmatprep.subr.mxu0 %v944_v37 }
 0x1c3   :  { %916 = vmatpush3.xpose.msk.msra.mxu0 %vm316_vm2, %v520_v5 }
 0x1c4   :  { %917 = vmatprep.subr.mxu0 %v944_v37 }
 0x1c7   :  { %918 = vmatpush3.xpose.msk.msra.mxu0 %vm316_vm2, %v519_v6 }
 0x1c8   :  { %919 = vmatprep.subr.mxu0 %v944_v37 }
 0x1cb   :  { %920 = vmatpush3.xpose.msk.msra.mxu0 %vm316_vm2, %v518_v9 }
 0x1cc   :  { %921 = vmatprep.subr.mxu0 %v944_v37 }
 0x1cf   :  { %922 = vmatpush3.xpose.msk.msra.mxu0 %vm316_vm2, %v517_v10 }
 0x1d0   :  { %923 = vmatprep.subr.mxu0 %v944_v37 }
 0x1d3   :  { %924 = vmatpush3.xpose.msk.msra.mxu0 %vm316_vm2, %v516_v13 }
 0x1d4   :  { %925 = vmatprep.subr.mxu0 %v944_v37 }
 0x1d7   :  { %926 = vmatpush3.xpose.msk.msra.mxu0 %vm316_vm2, %v515_v14 }
 0x1d8   :  { %927 = vmatprep.subr.mxu0 %v944_v37 }
 0x1db   :  { %928 = vmatpush3.xpose.msk.msra.mxu0 %vm316_vm2, %v514_v17 }
 0x1dc   :  { %929 = vmatprep.subr.mxu0 %v944_v37 }
 0x1df   :  { %930 = vmatpush3.xpose.msk.msra.mxu0 %vm316_vm2, %v513_v18 }
 0x1e0   :  { %931 = vmatprep.subr.mxu0 %v944_v37 }
 0x1e3   :  { %932 = vmatpush3.xpose.msk.msra.mxu0 %vm316_vm2, %v512_v21 }
 0x1e4   :  { %933 = vmatprep.subr.mxu0 %v944_v37 }
 0x1e7   :  { %934 = vmatpush3.xpose.msk.msra.mxu0 %vm316_vm2, %v511_v22 }
 0x1e8   :  { %935 = vmatprep.subr.mxu0 %v944_v37 }
 0x1eb   :  { %936 = vmatpush3.xpose.msk.msra.mxu0 %vm316_vm2, %v510_v24 }
 0x1ee   :  { %938 = vmatmul.mubr.msk.f32.vlgmr.msra.gmra.mxu0 %vm316_vm2, %v526_v25 }
 0x2ae   :  { %v650_v29 = vpop.f32.mrf.mxu0 }
 0x2af   :  { %v651_v30 = vadd.f32 %v650_v29, %v531_v27 }
 0x2b0   :  { %v939_v31 = vpop.f32.mrf.mxu0 }
 0x2b1   :  { %v657_v32 = vmax.f32 %v651_v30, -8.0 }
 0x2b3   :  { %v658_v33 = vsel %vm656_vm4, %v657_v32, %v651_v30 }
 0x2b4   :  { %659 = vst [vmem:[%s1144_s7] sm:$0x3] %v658_v33 }

</bundles_post_ra>
